<compile_context>
chip_gen: v6e
topology: v6e:2x2x1
jax: 0.10.0
libtpu: 0.0.40
codegen_flags: <defaults>
</compile_context>

<pallas_src>
import functools

import jax
import jax.numpy as jnp
import numpy as np
from jax import lax
from jax.experimental import pallas as pl
from jax.experimental.pallas import tpu as pltpu


def _res2block_kernel(x_ref, w_ref, b_ref, o_ref, s_ref, *,
                      scale, width, ksize, t_valid):
    """One batch element of Res2Block.

    x_ref:  (C, Tp)               input activations (channels x padded time)
    w_ref:  (n_conv, W, K*W)      tap-fused conv weights (mxu dtype)
    b_ref:  (n_conv, W, 1)        conv biases (f32)
    o_ref:  (C, Tp)               output
    s_ref:  (K*W, Tp + 2*pad)     scratch holding the K time-shifted copies of
                                  relu(out); halo columns stay zero and act as
                                  the conv's 'same' padding.
    """
    pad = ksize // 2
    Tp = x_ref.shape[-1]
    n_conv = w_ref.shape[0]
    s_dtype = s_ref.dtype

    # Zero only the halo columns (<= 2*pad per tap block).  Interiors are
    # fully rewritten for every split, so this is all the padding zeros the
    # convs ever need.  Done every grid step -> safe under megacore sharding.
    for k in range(ksize):
        left = 2 * pad - k
        if left > 0:
            s_ref[k * width:(k + 1) * width, 0:left] = jnp.zeros(
                (width, left), s_dtype)
        if k > 0:
            s_ref[k * width:(k + 1) * width, Tp + 2 * pad - k:] = jnp.zeros(
                (width, k), s_dtype)

    def load_split(g):                       # lazy split read, f32 for VPU math
        return x_ref[g * width:(g + 1) * width, :].astype(jnp.float32)

    if t_valid != Tp:                        # hoisted once (not per split)
        lane = lax.broadcasted_iota(jnp.int32, (width, Tp), 1)
        valid = lane < t_valid
    else:
        valid = None

    s0 = load_split(0)
    # output group 0: splits[0] + outputs[0] == 2 * splits[0]
    o_ref[0:width, :] = (s0 + s0).astype(o_ref.dtype)

    out = s0                                 # conv-chain state (f32)
    for j in range(n_conv):
        h = jnp.maximum(out, 0.0)            # ReLU
        if valid is not None:
            h = jnp.where(valid, h, 0.0)     # padded time must stay zero
        hq = h.astype(s_dtype)

        # Stack the K time-shifted copies on the sublane axis so a single
        # matmul with contraction K*width replaces K small matmuls + adds.
        for k in range(ksize):
            off = 2 * pad - k
            s_ref[k * width:(k + 1) * width, off:off + Tp] = hq

        rhs = s_ref[:, pad:pad + Tp]                          # (K*W, Tp)
        out = jnp.dot(w_ref[j], rhs,
                      preferred_element_type=jnp.float32) + b_ref[j]

        # Stream the finished channel groups straight to the output block.
        g = 2 * j + 1                                         # conv-fed group
        o_ref[g * width:(g + 1) * width, :] = (
            load_split(g) + out).astype(o_ref.dtype)
        g = 2 * j + 2                                         # pass-through
        if g < scale:
            o_ref[g * width:(g + 1) * width, :] = (
                load_split(g) + load_split(j + 1)).astype(o_ref.dtype)


def res2block_pallas(x, w, b, *, scale, kernel_size, mxu_dtype=jnp.float32):
    """x: (B, C, T); w: (scale-1, W, W, K); b: (scale-1, W).  Returns (B, C, T)."""
    B, C, T = x.shape
    assert scale >= 2 and C % scale == 0
    assert kernel_size % 2 == 1, "'same' padding assumes odd kernel_size"
    width = C // scale
    pad = kernel_size // 2
    # Convs beyond index scale//2 - 1 never reach torch.cat(outputs[:scale]).
    n_conv = scale // 2

    # Lane-dense blocks: pad time to a multiple of 128 (masked inside kernel).
    Tp = max(128, ((T + 127) // 128) * 128)
    xp = x if Tp == T else jnp.pad(x, ((0, 0), (0, 0), (0, Tp - T)))

    # Tap fusion: w_f[i, co, k*W + ci] = w[i, co, ci, k]  ->  (n_conv, W, K*W)
    w_f = jnp.transpose(w[:n_conv], (0, 1, 3, 2)).reshape(
        n_conv, width, kernel_size * width).astype(mxu_dtype)
    b_r = b[:n_conv].astype(jnp.float32)[:, :, None]          # (n_conv, W, 1)

    kernel = functools.partial(_res2block_kernel, scale=scale, width=width,
                               ksize=kernel_size, t_valid=T)

    itm = jnp.dtype(x.dtype).itemsize
    mitm = jnp.dtype(mxu_dtype).itemsize
    vmem_need = (2 * 2 * C * Tp * itm                          # in/out, 2x buffered
                 + kernel_size * width * (Tp + 2 * pad) * mitm # scratch
                 + n_conv * width * kernel_size * width * mitm # weights
                 + n_conv * width * 4)                         # bias
    vmem_limit = int(min(max(2 * vmem_need, 32 * 2**20), 64 * 2**20))

    y = pl.pallas_call(
        kernel,
        out_shape=jax.ShapeDtypeStruct((B, C, Tp), x.dtype),
        grid_spec=pltpu.PrefetchScalarGridSpec(
            num_scalar_prefetch=0,
            grid=(B,),
            in_specs=[
                pl.BlockSpec((None, C, Tp), lambda i: (i, 0, 0)),            # x
                pl.BlockSpec((n_conv, width, kernel_size * width),
                             lambda i: (0, 0, 0)),                           # fused w
                pl.BlockSpec((n_conv, width, 1), lambda i: (0, 0, 0)),       # bias
            ],
            out_specs=pl.BlockSpec((None, C, Tp), lambda i: (i, 0, 0)),
            scratch_shapes=[
                pltpu.VMEM((kernel_size * width, Tp + 2 * pad), mxu_dtype)],
        ),
        compiler_params=pltpu.CompilerParams(
            dimension_semantics=("parallel",),      # keep B even on v7x (2 TCs)
            vmem_limit_bytes=vmem_limit),
    )(xp, w_f, b_r)

    return y if Tp == T else y[:, :, :T]


def res2block_ref(x, w, b, *, scale, kernel_size):
    """Pure-JAX reference mirroring the PyTorch forward exactly."""
    width = x.shape[1] // scale
    pad = kernel_size // 2
    splits = [x[:, i * width:(i + 1) * width, :] for i in range(scale)]
    out = splits[0]
    outputs = [out]
    for i in range(scale - 1):
        h = jax.nn.relu(out)
        out = lax.conv_general_dilated(
            h, w[i], window_strides=(1,), padding=((pad, pad),),
            dimension_numbers=("NCH", "OIH", "NCH")) + b[i][None, :, None]
        outputs.append(out)
        outputs.append(splits[i + 1])
    return x + jnp.concatenate(outputs[:scale], axis=1)


if __name__ == "__main__":
    B, C, T = 2, 128, 100          # small; W = 16 (bf16-friendly), T padded to 128
    SCALE, KSIZE = 8, 3
    WIDTH = C // SCALE

    key = jax.random.PRNGKey(0)
    kx, kw, kb = jax.random.split(key, 3)
    x = jax.random.normal(kx, (B, C, T), dtype=jnp.float32)
    w = 0.1 * jax.random.normal(kw, (SCALE - 1, WIDTH, WIDTH, KSIZE),
                                dtype=jnp.float32)
    b = 0.1 * jax.random.normal(kb, (SCALE - 1, WIDTH), dtype=jnp.float32)

    # f32 everywhere (v5e-style configuration).
    y = jax.block_until_ready(
        res2block_pallas(x, w, b, scale=SCALE, kernel_size=KSIZE))
    y_ref = res2block_ref(x, w, b, scale=SCALE, kernel_size=KSIZE)
    np.testing.assert_allclose(np.asarray(y), np.asarray(y_ref),
                               rtol=1e-4, atol=1e-4)

    # bf16 activations + bf16 MXU operands, f32 accumulate/element-wise
    # (recommended on v6e / v7x: halves HBM traffic and VMEM tiles).
    x_bf = x.astype(jnp.bfloat16)
    y_bf = jax.block_until_ready(
        res2block_pallas(x_bf, w, b, scale=SCALE, kernel_size=KSIZE,
                         mxu_dtype=jnp.bfloat16))
    y_ref_bf = res2block_ref(x_bf.astype(jnp.float32), w, b,
                             scale=SCALE, kernel_size=KSIZE)
    np.testing.assert_allclose(np.asarray(y_bf.astype(jnp.float32)),
                               np.asarray(y_ref_bf), rtol=5e-2, atol=5e-2)

    print("KERNEL_OK")
</pallas_src>

<mosaic_0001>
module attributes {stable_mosaic.version = 11 : i64} {
  func.func @_res2block_kernel(%arg0: i32, %arg1: memref<1x128x128xf32, #tpu.memory_space<vmem>>, %arg2: memref<4x16x48xf32, #tpu.memory_space<vmem>>, %arg3: memref<4x16x1xf32, #tpu.memory_space<vmem>>, %arg4: memref<1x128x128xf32, #tpu.memory_space<vmem>>, %arg5: memref<48x130xf32, #tpu.memory_space<vmem>>) attributes {dimension_semantics = [#tpu.dimension_semantics<parallel>], iteration_bounds = array<i64: 2>, scalar_prefetch = 0 : i64, scratch_operands = 1 : i64, tpu.core_type = #tpu.core_type<tc>, window_params = [{transform_indices = @transform_0, window_bounds = array<i64: 1, 128, 128>}, {pipeline_mode = #tpu.pipeline_mode<synchronous>, transform_indices = @transform_1, window_bounds = array<i64: 4, 16, 48>}, {pipeline_mode = #tpu.pipeline_mode<synchronous>, transform_indices = @transform_2, window_bounds = array<i64: 4, 16, 1>}, {transform_indices = @transform_3, window_bounds = array<i64: 1, 128, 128>}]} {
    %cst = arith.constant 0.000000e+00 : f32
    %0 = vector.broadcast %cst : f32 to vector<16x2xf32>
    %c0 = arith.constant 0 : index
    %c0_0 = arith.constant 0 : index
    %1 = vector.load %arg5[%c0, %c0_0] : memref<48x130xf32, #tpu.memory_space<vmem>>, vector<16x2xf32>
    tpu.vector_store %arg5[%c0, %c0_0], %0 {strides = array<i32>} : memref<48x130xf32, #tpu.memory_space<vmem>>, vector<16x2xf32>,
    %cst_1 = arith.constant 0.000000e+00 : f32
    %2 = vector.broadcast %cst_1 : f32 to vector<16x1xf32>
    %c16 = arith.constant 16 : index
    %c0_2 = arith.constant 0 : index
    %3 = vector.load %arg5[%c16, %c0_2] : memref<48x130xf32, #tpu.memory_space<vmem>>, vector<16x1xf32>
    tpu.vector_store %arg5[%c16, %c0_2], %2 {strides = array<i32>} : memref<48x130xf32, #tpu.memory_space<vmem>>, vector<16x1xf32>,
    %cst_3 = arith.constant 0.000000e+00 : f32
    %4 = vector.broadcast %cst_3 : f32 to vector<16x1xf32>
    %c16_4 = arith.constant 16 : index
    %c129 = arith.constant 129 : index
    %5 = vector.load %arg5[%c16_4, %c129] : memref<48x130xf32, #tpu.memory_space<vmem>>, vector<16x1xf32>
    tpu.vector_store %arg5[%c16_4, %c129], %4 {strides = array<i32>} : memref<48x130xf32, #tpu.memory_space<vmem>>, vector<16x1xf32>,
    %cst_5 = arith.constant 0.000000e+00 : f32
    %6 = vector.broadcast %cst_5 : f32 to vector<16x2xf32>
    %c32 = arith.constant 32 : index
    %c128 = arith.constant 128 : index
    %7 = vector.load %arg5[%c32, %c128] : memref<48x130xf32, #tpu.memory_space<vmem>>, vector<16x2xf32>
    tpu.vector_store %arg5[%c32, %c128], %6 {strides = array<i32>} : memref<48x130xf32, #tpu.memory_space<vmem>>, vector<16x2xf32>,
    %8 = tpu.iota {dimensions = array<i32: 1>} : vector<16x128xi32>
    %c100_i32 = arith.constant 100 : i32
    %9 = vector.broadcast %c100_i32 : i32 to vector<16x128xi32>
    %10 = arith.cmpi slt, %8, %9 : vector<16x128xi32>
    %c0_6 = arith.constant 0 : index
    %c0_7 = arith.constant 0 : index
    %c0_8 = arith.constant 0 : index
    %11 = vector.load %arg1[%c0_6, %c0_7, %c0_8] : memref<1x128x128xf32, #tpu.memory_space<vmem>>, vector<1x16x128xf32>
    %12 = vector.shape_cast %11 : vector<1x16x128xf32> to vector<16x128xf32>
    %13 = arith.addf %12, %12 : vector<16x128xf32>
    %c0_9 = arith.constant 0 : index
    %c0_10 = arith.constant 0 : index
    %c0_11 = arith.constant 0 : index
    %14 = vector.load %arg4[%c0_9, %c0_10, %c0_11] : memref<1x128x128xf32, #tpu.memory_space<vmem>>, vector<1x16x128xf32>
    %15 = vector.shape_cast %14 : vector<1x16x128xf32> to vector<16x128xf32>
    %16 = vector.shape_cast %13 : vector<16x128xf32> to vector<1x16x128xf32>
    tpu.vector_store %arg4[%c0_9, %c0_10, %c0_11], %16 {strides = array<i32>} : memref<1x128x128xf32, #tpu.memory_space<vmem>>, vector<1x16x128xf32>,
    %cst_12 = arith.constant 0.000000e+00 : f32
    %17 = vector.broadcast %cst_12 : f32 to vector<16x128xf32>
    %18 = arith.maximumf %12, %17 : vector<16x128xf32>
    %cst_13 = arith.constant 0.000000e+00 : f32
    %19 = vector.broadcast %cst_13 : f32 to vector<16x128xf32>
    %20 = arith.select %10, %18, %19 : vector<16x128xi1>, vector<16x128xf32>
    %c0_14 = arith.constant 0 : index
    %c2 = arith.constant 2 : index
    %21 = vector.load %arg5[%c0_14, %c2] : memref<48x130xf32, #tpu.memory_space<vmem>>, vector<16x128xf32>
    tpu.vector_store %arg5[%c0_14, %c2], %20 {strides = array<i32>} : memref<48x130xf32, #tpu.memory_space<vmem>>, vector<16x128xf32>,
    %c16_15 = arith.constant 16 : index
    %c1 = arith.constant 1 : index
    %22 = vector.load %arg5[%c16_15, %c1] : memref<48x130xf32, #tpu.memory_space<vmem>>, vector<16x128xf32>
    tpu.vector_store %arg5[%c16_15, %c1], %20 {strides = array<i32>} : memref<48x130xf32, #tpu.memory_space<vmem>>, vector<16x128xf32>,
    %c32_16 = arith.constant 32 : index
    %c0_17 = arith.constant 0 : index
    %23 = vector.load %arg5[%c32_16, %c0_17] : memref<48x130xf32, #tpu.memory_space<vmem>>, vector<16x128xf32>
    tpu.vector_store %arg5[%c32_16, %c0_17], %20 {strides = array<i32>} : memref<48x130xf32, #tpu.memory_space<vmem>>, vector<16x128xf32>,
    %c0_18 = arith.constant 0 : index
    %c1_19 = arith.constant 1 : index
    %24 = vector.load %arg5[%c0_18, %c1_19] : memref<48x130xf32, #tpu.memory_space<vmem>>, vector<48x128xf32>
    %c0_20 = arith.constant 0 : index
    %c0_21 = arith.constant 0 : index
    %c0_22 = arith.constant 0 : index
    %25 = vector.load %arg2[%c0_20, %c0_21, %c0_22] : memref<4x16x48xf32, #tpu.memory_space<vmem>>, vector<1x16x48xf32>
    %26 = vector.shape_cast %25 : vector<1x16x48xf32> to vector<16x48xf32>
    %cst_23 = arith.constant dense<0.000000e+00> : vector<16x128xf32>
    %27 = tpu.matmul %26, %24, %cst_23 {dimension_numbers = #tpu.dot_dimension_numbers<[1], [0], [0], [1], [0, 0, 1, 1], [], []>} : vector<16x48xf32>, vector<48x128xf32>, vector<16x128xf32> -> vector<16x128xf32>
    %c0_24 = arith.constant 0 : index
    %c0_25 = arith.constant 0 : index
    %c0_26 = arith.constant 0 : index
    %28 = vector.load %arg3[%c0_24, %c0_25, %c0_26] : memref<4x16x1xf32, #tpu.memory_space<vmem>>, vector<1x16x1xf32>
    %29 = vector.shape_cast %28 : vector<1x16x1xf32> to vector<16x1xf32>
    %30 = vector.broadcast %29 : vector<16x1xf32> to vector<16x128xf32>
    %31 = arith.addf %27, %30 : vector<16x128xf32>
    %c0_27 = arith.constant 0 : index
    %c16_28 = arith.constant 16 : index
    %c0_29 = arith.constant 0 : index
    %32 = vector.load %arg1[%c0_27, %c16_28, %c0_29] : memref<1x128x128xf32, #tpu.memory_space<vmem>>, vector<1x16x128xf32>
    %33 = vector.shape_cast %32 : vector<1x16x128xf32> to vector<16x128xf32>
    %34 = arith.addf %33, %31 : vector<16x128xf32>
    %c0_30 = arith.constant 0 : index
    %c16_31 = arith.constant 16 : index
    %c0_32 = arith.constant 0 : index
    %35 = vector.load %arg4[%c0_30, %c16_31, %c0_32] : memref<1x128x128xf32, #tpu.memory_space<vmem>>, vector<1x16x128xf32>
    %36 = vector.shape_cast %35 : vector<1x16x128xf32> to vector<16x128xf32>
    %37 = vector.shape_cast %34 : vector<16x128xf32> to vector<1x16x128xf32>
    tpu.vector_store %arg4[%c0_30, %c16_31, %c0_32], %37 {strides = array<i32>} : memref<1x128x128xf32, #tpu.memory_space<vmem>>, vector<1x16x128xf32>,
    %c0_33 = arith.constant 0 : index
    %c32_34 = arith.constant 32 : index
    %c0_35 = arith.constant 0 : index
    %38 = vector.load %arg1[%c0_33, %c32_34, %c0_35] : memref<1x128x128xf32, #tpu.memory_space<vmem>>, vector<1x16x128xf32>
    %39 = vector.shape_cast %38 : vector<1x16x128xf32> to vector<16x128xf32>
    %c0_36 = arith.constant 0 : index
    %c16_37 = arith.constant 16 : index
    %c0_38 = arith.constant 0 : index
    %40 = vector.load %arg1[%c0_36, %c16_37, %c0_38] : memref<1x128x128xf32, #tpu.memory_space<vmem>>, vector<1x16x128xf32>
    %41 = vector.shape_cast %40 : vector<1x16x128xf32> to vector<16x128xf32>
    %42 = arith.addf %39, %41 : vector<16x128xf32>
    %c0_39 = arith.constant 0 : index
    %c32_40 = arith.constant 32 : index
    %c0_41 = arith.constant 0 : index
    %43 = vector.load %arg4[%c0_39, %c32_40, %c0_41] : memref<1x128x128xf32, #tpu.memory_space<vmem>>, vector<1x16x128xf32>
    %44 = vector.shape_cast %43 : vector<1x16x128xf32> to vector<16x128xf32>
    %45 = vector.shape_cast %42 : vector<16x128xf32> to vector<1x16x128xf32>
    tpu.vector_store %arg4[%c0_39, %c32_40, %c0_41], %45 {strides = array<i32>} : memref<1x128x128xf32, #tpu.memory_space<vmem>>, vector<1x16x128xf32>,
    %cst_42 = arith.constant 0.000000e+00 : f32
    %46 = vector.broadcast %cst_42 : f32 to vector<16x128xf32>
    %47 = arith.maximumf %31, %46 : vector<16x128xf32>
    %cst_43 = arith.constant 0.000000e+00 : f32
    %48 = vector.broadcast %cst_43 : f32 to vector<16x128xf32>
    %49 = arith.select %10, %47, %48 : vector<16x128xi1>, vector<16x128xf32>
    %c0_44 = arith.constant 0 : index
    %c2_45 = arith.constant 2 : index
    %50 = vector.load %arg5[%c0_44, %c2_45] : memref<48x130xf32, #tpu.memory_space<vmem>>, vector<16x128xf32>
    tpu.vector_store %arg5[%c0_44, %c2_45], %49 {strides = array<i32>} : memref<48x130xf32, #tpu.memory_space<vmem>>, vector<16x128xf32>,
    %c16_46 = arith.constant 16 : index
    %c1_47 = arith.constant 1 : index
    %51 = vector.load %arg5[%c16_46, %c1_47] : memref<48x130xf32, #tpu.memory_space<vmem>>, vector<16x128xf32>
    tpu.vector_store %arg5[%c16_46, %c1_47], %49 {strides = array<i32>} : memref<48x130xf32, #tpu.memory_space<vmem>>, vector<16x128xf32>,
    %c32_48 = arith.constant 32 : index
    %c0_49 = arith.constant 0 : index
    %52 = vector.load %arg5[%c32_48, %c0_49] : memref<48x130xf32, #tpu.memory_space<vmem>>, vector<16x128xf32>
    tpu.vector_store %arg5[%c32_48, %c0_49], %49 {strides = array<i32>} : memref<48x130xf32, #tpu.memory_space<vmem>>, vector<16x128xf32>,
    %c0_50 = arith.constant 0 : index
    %c1_51 = arith.constant 1 : index
    %53 = vector.load %arg5[%c0_50, %c1_51] : memref<48x130xf32, #tpu.memory_space<vmem>>, vector<48x128xf32>
    %c1_52 = arith.constant 1 : index
    %c0_53 = arith.constant 0 : index
    %c0_54 = arith.constant 0 : index
    %54 = vector.load %arg2[%c1_52, %c0_53, %c0_54] : memref<4x16x48xf32, #tpu.memory_space<vmem>>, vector<1x16x48xf32>
    %55 = vector.shape_cast %54 : vector<1x16x48xf32> to vector<16x48xf32>
    %cst_55 = arith.constant dense<0.000000e+00> : vector<16x128xf32>
    %56 = tpu.matmul %55, %53, %cst_55 {dimension_numbers = #tpu.dot_dimension_numbers<[1], [0], [0], [1], [0, 0, 1, 1], [], []>} : vector<16x48xf32>, vector<48x128xf32>, vector<16x128xf32> -> vector<16x128xf32>
    %c1_56 = arith.constant 1 : index
    %c0_57 = arith.constant 0 : index
    %c0_58 = arith.constant 0 : index
    %57 = vector.load %arg3[%c1_56, %c0_57, %c0_58] : memref<4x16x1xf32, #tpu.memory_space<vmem>>, vector<1x16x1xf32>
    %58 = vector.shape_cast %57 : vector<1x16x1xf32> to vector<16x1xf32>
    %59 = vector.broadcast %58 : vector<16x1xf32> to vector<16x128xf32>
    %60 = arith.addf %56, %59 : vector<16x128xf32>
    %c0_59 = arith.constant 0 : index
    %c48 = arith.constant 48 : index
    %c0_60 = arith.constant 0 : index
    %61 = vector.load %arg1[%c0_59, %c48, %c0_60] : memref<1x128x128xf32, #tpu.memory_space<vmem>>, vector<1x16x128xf32>
    %62 = vector.shape_cast %61 : vector<1x16x128xf32> to vector<16x128xf32>
    %63 = arith.addf %62, %60 : vector<16x128xf32>
    %c0_61 = arith.constant 0 : index
    %c48_62 = arith.constant 48 : index
    %c0_63 = arith.constant 0 : index
    %64 = vector.load %arg4[%c0_61, %c48_62, %c0_63] : memref<1x128x128xf32, #tpu.memory_space<vmem>>, vector<1x16x128xf32>
    %65 = vector.shape_cast %64 : vector<1x16x128xf32> to vector<16x128xf32>
    %66 = vector.shape_cast %63 : vector<16x128xf32> to vector<1x16x128xf32>
    tpu.vector_store %arg4[%c0_61, %c48_62, %c0_63], %66 {strides = array<i32>} : memref<1x128x128xf32, #tpu.memory_space<vmem>>, vector<1x16x128xf32>,
    %c0_64 = arith.constant 0 : index
    %c64 = arith.constant 64 : index
    %c0_65 = arith.constant 0 : index
    %67 = vector.load %arg1[%c0_64, %c64, %c0_65] : memref<1x128x128xf32, #tpu.memory_space<vmem>>, vector<1x16x128xf32>
    %68 = vector.shape_cast %67 : vector<1x16x128xf32> to vector<16x128xf32>
    %c0_66 = arith.constant 0 : index
    %c32_67 = arith.constant 32 : index
    %c0_68 = arith.constant 0 : index
    %69 = vector.load %arg1[%c0_66, %c32_67, %c0_68] : memref<1x128x128xf32, #tpu.memory_space<vmem>>, vector<1x16x128xf32>
    %70 = vector.shape_cast %69 : vector<1x16x128xf32> to vector<16x128xf32>
    %71 = arith.addf %68, %70 : vector<16x128xf32>
    %c0_69 = arith.constant 0 : index
    %c64_70 = arith.constant 64 : index
    %c0_71 = arith.constant 0 : index
    %72 = vector.load %arg4[%c0_69, %c64_70, %c0_71] : memref<1x128x128xf32, #tpu.memory_space<vmem>>, vector<1x16x128xf32>
    %73 = vector.shape_cast %72 : vector<1x16x128xf32> to vector<16x128xf32>
    %74 = vector.shape_cast %71 : vector<16x128xf32> to vector<1x16x128xf32>
    tpu.vector_store %arg4[%c0_69, %c64_70, %c0_71], %74 {strides = array<i32>} : memref<1x128x128xf32, #tpu.memory_space<vmem>>, vector<1x16x128xf32>,
    %cst_72 = arith.constant 0.000000e+00 : f32
    %75 = vector.broadcast %cst_72 : f32 to vector<16x128xf32>
    %76 = arith.maximumf %60, %75 : vector<16x128xf32>
    %cst_73 = arith.constant 0.000000e+00 : f32
    %77 = vector.broadcast %cst_73 : f32 to vector<16x128xf32>
    %78 = arith.select %10, %76, %77 : vector<16x128xi1>, vector<16x128xf32>
    %c0_74 = arith.constant 0 : index
    %c2_75 = arith.constant 2 : index
    %79 = vector.load %arg5[%c0_74, %c2_75] : memref<48x130xf32, #tpu.memory_space<vmem>>, vector<16x128xf32>
    tpu.vector_store %arg5[%c0_74, %c2_75], %78 {strides = array<i32>} : memref<48x130xf32, #tpu.memory_space<vmem>>, vector<16x128xf32>,
    %c16_76 = arith.constant 16 : index
    %c1_77 = arith.constant 1 : index
    %80 = vector.load %arg5[%c16_76, %c1_77] : memref<48x130xf32, #tpu.memory_space<vmem>>, vector<16x128xf32>
    tpu.vector_store %arg5[%c16_76, %c1_77], %78 {strides = array<i32>} : memref<48x130xf32, #tpu.memory_space<vmem>>, vector<16x128xf32>,
    %c32_78 = arith.constant 32 : index
    %c0_79 = arith.constant 0 : index
    %81 = vector.load %arg5[%c32_78, %c0_79] : memref<48x130xf32, #tpu.memory_space<vmem>>, vector<16x128xf32>
    tpu.vector_store %arg5[%c32_78, %c0_79], %78 {strides = array<i32>} : memref<48x130xf32, #tpu.memory_space<vmem>>, vector<16x128xf32>,
    %c0_80 = arith.constant 0 : index
    %c1_81 = arith.constant 1 : index
    %82 = vector.load %arg5[%c0_80, %c1_81] : memref<48x130xf32, #tpu.memory_space<vmem>>, vector<48x128xf32>
    %c2_82 = arith.constant 2 : index
    %c0_83 = arith.constant 0 : index
    %c0_84 = arith.constant 0 : index
    %83 = vector.load %arg2[%c2_82, %c0_83, %c0_84] : memref<4x16x48xf32, #tpu.memory_space<vmem>>, vector<1x16x48xf32>
    %84 = vector.shape_cast %83 : vector<1x16x48xf32> to vector<16x48xf32>
    %cst_85 = arith.constant dense<0.000000e+00> : vector<16x128xf32>
    %85 = tpu.matmul %84, %82, %cst_85 {dimension_numbers = #tpu.dot_dimension_numbers<[1], [0], [0], [1], [0, 0, 1, 1], [], []>} : vector<16x48xf32>, vector<48x128xf32>, vector<16x128xf32> -> vector<16x128xf32>
    %c2_86 = arith.constant 2 : index
    %c0_87 = arith.constant 0 : index
    %c0_88 = arith.constant 0 : index
    %86 = vector.load %arg3[%c2_86, %c0_87, %c0_88] : memref<4x16x1xf32, #tpu.memory_space<vmem>>, vector<1x16x1xf32>
    %87 = vector.shape_cast %86 : vector<1x16x1xf32> to vector<16x1xf32>
    %88 = vector.broadcast %87 : vector<16x1xf32> to vector<16x128xf32>
    %89 = arith.addf %85, %88 : vector<16x128xf32>
    %c0_89 = arith.constant 0 : index
    %c80 = arith.constant 80 : index
    %c0_90 = arith.constant 0 : index
    %90 = vector.load %arg1[%c0_89, %c80, %c0_90] : memref<1x128x128xf32, #tpu.memory_space<vmem>>, vector<1x16x128xf32>
    %91 = vector.shape_cast %90 : vector<1x16x128xf32> to vector<16x128xf32>
    %92 = arith.addf %91, %89 : vector<16x128xf32>
    %c0_91 = arith.constant 0 : index
    %c80_92 = arith.constant 80 : index
    %c0_93 = arith.constant 0 : index
    %93 = vector.load %arg4[%c0_91, %c80_92, %c0_93] : memref<1x128x128xf32, #tpu.memory_space<vmem>>, vector<1x16x128xf32>
    %94 = vector.shape_cast %93 : vector<1x16x128xf32> to vector<16x128xf32>
    %95 = vector.shape_cast %92 : vector<16x128xf32> to vector<1x16x128xf32>
    tpu.vector_store %arg4[%c0_91, %c80_92, %c0_93], %95 {strides = array<i32>} : memref<1x128x128xf32, #tpu.memory_space<vmem>>, vector<1x16x128xf32>,
    %c0_94 = arith.constant 0 : index
    %c96 = arith.constant 96 : index
    %c0_95 = arith.constant 0 : index
    %96 = vector.load %arg1[%c0_94, %c96, %c0_95] : memref<1x128x128xf32, #tpu.memory_space<vmem>>, vector<1x16x128xf32>
    %97 = vector.shape_cast %96 : vector<1x16x128xf32> to vector<16x128xf32>
    %c0_96 = arith.constant 0 : index
    %c48_97 = arith.constant 48 : index
    %c0_98 = arith.constant 0 : index
    %98 = vector.load %arg1[%c0_96, %c48_97, %c0_98] : memref<1x128x128xf32, #tpu.memory_space<vmem>>, vector<1x16x128xf32>
    %99 = vector.shape_cast %98 : vector<1x16x128xf32> to vector<16x128xf32>
    %100 = arith.addf %97, %99 : vector<16x128xf32>
    %c0_99 = arith.constant 0 : index
    %c96_100 = arith.constant 96 : index
    %c0_101 = arith.constant 0 : index
    %101 = vector.load %arg4[%c0_99, %c96_100, %c0_101] : memref<1x128x128xf32, #tpu.memory_space<vmem>>, vector<1x16x128xf32>
    %102 = vector.shape_cast %101 : vector<1x16x128xf32> to vector<16x128xf32>
    %103 = vector.shape_cast %100 : vector<16x128xf32> to vector<1x16x128xf32>
    tpu.vector_store %arg4[%c0_99, %c96_100, %c0_101], %103 {strides = array<i32>} : memref<1x128x128xf32, #tpu.memory_space<vmem>>, vector<1x16x128xf32>,
    %cst_102 = arith.constant 0.000000e+00 : f32
    %104 = vector.broadcast %cst_102 : f32 to vector<16x128xf32>
    %105 = arith.maximumf %89, %104 : vector<16x128xf32>
    %cst_103 = arith.constant 0.000000e+00 : f32
    %106 = vector.broadcast %cst_103 : f32 to vector<16x128xf32>
    %107 = arith.select %10, %105, %106 : vector<16x128xi1>, vector<16x128xf32>
    %c0_104 = arith.constant 0 : index
    %c2_105 = arith.constant 2 : index
    %108 = vector.load %arg5[%c0_104, %c2_105] : memref<48x130xf32, #tpu.memory_space<vmem>>, vector<16x128xf32>
    tpu.vector_store %arg5[%c0_104, %c2_105], %107 {strides = array<i32>} : memref<48x130xf32, #tpu.memory_space<vmem>>, vector<16x128xf32>,
    %c16_106 = arith.constant 16 : index
    %c1_107 = arith.constant 1 : index
    %109 = vector.load %arg5[%c16_106, %c1_107] : memref<48x130xf32, #tpu.memory_space<vmem>>, vector<16x128xf32>
    tpu.vector_store %arg5[%c16_106, %c1_107], %107 {strides = array<i32>} : memref<48x130xf32, #tpu.memory_space<vmem>>, vector<16x128xf32>,
    %c32_108 = arith.constant 32 : index
    %c0_109 = arith.constant 0 : index
    %110 = vector.load %arg5[%c32_108, %c0_109] : memref<48x130xf32, #tpu.memory_space<vmem>>, vector<16x128xf32>
    tpu.vector_store %arg5[%c32_108, %c0_109], %107 {strides = array<i32>} : memref<48x130xf32, #tpu.memory_space<vmem>>, vector<16x128xf32>,
    %c0_110 = arith.constant 0 : index
    %c1_111 = arith.constant 1 : index
    %111 = vector.load %arg5[%c0_110, %c1_111] : memref<48x130xf32, #tpu.memory_space<vmem>>, vector<48x128xf32>
    %c3 = arith.constant 3 : index
    %c0_112 = arith.constant 0 : index
    %c0_113 = arith.constant 0 : index
    %112 = vector.load %arg2[%c3, %c0_112, %c0_113] : memref<4x16x48xf32, #tpu.memory_space<vmem>>, vector<1x16x48xf32>
    %113 = vector.shape_cast %112 : vector<1x16x48xf32> to vector<16x48xf32>
    %cst_114 = arith.constant dense<0.000000e+00> : vector<16x128xf32>
    %114 = tpu.matmul %113, %111, %cst_114 {dimension_numbers = #tpu.dot_dimension_numbers<[1], [0], [0], [1], [0, 0, 1, 1], [], []>} : vector<16x48xf32>, vector<48x128xf32>, vector<16x128xf32> -> vector<16x128xf32>
    %c3_115 = arith.constant 3 : index
    %c0_116 = arith.constant 0 : index
    %c0_117 = arith.constant 0 : index
    %115 = vector.load %arg3[%c3_115, %c0_116, %c0_117] : memref<4x16x1xf32, #tpu.memory_space<vmem>>, vector<1x16x1xf32>
    %116 = vector.shape_cast %115 : vector<1x16x1xf32> to vector<16x1xf32>
    %117 = vector.broadcast %116 : vector<16x1xf32> to vector<16x128xf32>
    %118 = arith.addf %114, %117 : vector<16x128xf32>
    %c0_118 = arith.constant 0 : index
    %c112 = arith.constant 112 : index
    %c0_119 = arith.constant 0 : index
    %119 = vector.load %arg1[%c0_118, %c112, %c0_119] : memref<1x128x128xf32, #tpu.memory_space<vmem>>, vector<1x16x128xf32>
    %120 = vector.shape_cast %119 : vector<1x16x128xf32> to vector<16x128xf32>
    %121 = arith.addf %120, %118 : vector<16x128xf32>
    %c0_120 = arith.constant 0 : index
    %c112_121 = arith.constant 112 : index
    %c0_122 = arith.constant 0 : index
    %122 = vector.load %arg4[%c0_120, %c112_121, %c0_122] : memref<1x128x128xf32, #tpu.memory_space<vmem>>, vector<1x16x128xf32>
    %123 = vector.shape_cast %122 : vector<1x16x128xf32> to vector<16x128xf32>
    %124 = vector.shape_cast %121 : vector<16x128xf32> to vector<1x16x128xf32>
    tpu.vector_store %arg4[%c0_120, %c112_121, %c0_122], %124 {strides = array<i32>} : memref<1x128x128xf32, #tpu.memory_space<vmem>>, vector<1x16x128xf32>,
    return
  }
  func.func @transform_0(%arg0: i32) -> (i32, i32, i32) {
    %c0_i32 = arith.constant 0 : i32
    %c0_i32_0 = arith.constant 0 : i32
    %c0_i32_1 = arith.constant 0 : i32
    return %arg0, %c0_i32, %c0_i32_0 : i32, i32, i32
  }
  func.func @transform_1(%arg0: i32) -> (i32, i32, i32) {
    %c0_i32 = arith.constant 0 : i32
    %c0_i32_0 = arith.constant 0 : i32
    %c0_i32_1 = arith.constant 0 : i32
    %c0_i32_2 = arith.constant 0 : i32
    return %c0_i32, %c0_i32_0, %c0_i32_1 : i32, i32, i32
  }
  func.func @transform_2(%arg0: i32) -> (i32, i32, i32) {
    %c0_i32 = arith.constant 0 : i32
    %c0_i32_0 = arith.constant 0 : i32
    %c0_i32_1 = arith.constant 0 : i32
    %c0_i32_2 = arith.constant 0 : i32
    return %c0_i32, %c0_i32_0, %c0_i32_1 : i32, i32, i32
  }
  func.func @transform_3(%arg0: i32) -> (i32, i32, i32) {
    %c0_i32 = arith.constant 0 : i32
    %c0_i32_0 = arith.constant 0 : i32
    %c0_i32_1 = arith.constant 0 : i32
    return %arg0, %c0_i32, %c0_i32_0 : i32, i32, i32
  }
}

</mosaic_0001>

<bundles_post_ra>
// kernel: tpu_custom_call.1
= control target key start
LH: loop header
LB: loop body
LE: loop exit
PB: predicated region body
PF: predicated region fallthrough
CT: control target
= control target key end

     0   :  { %8 = vsyncpa [#allocation4], 0  ;;  %s1816_s0 = inlined_call_operand.hbm [shape: f32[2,128,128], index: 0, kind: input, shape index: {}]   ;;  %s1817_s1 = inlined_call_operand.vmem [shape: f32[4,16,48], index: 1, kind: input, shape index: {}]   ;;  %s1818_s2 = inlined_call_operand.vmem [shape: f32[4,16,1], index: 2, kind: input, shape index: {}]   ;;  %s1819_s3 = inlined_call_operand.hbm [shape: f32[2,128,128], index: 3, kind: output, shape index: {}]  }
   0x1   :  { %10 = vsyncpa [#allocation4 + $0x1], 0 }
   0x2   :  { %11 = vsyncpa [#allocation5], 0 }
   0x3   :  { %13 = vsyncpa [#allocation5 + $0x1], 0  ;;  %s1396_s12 = smov 0   ;;  %s1398_s13 = smov 0  }
   0x4   :  { %s1400_s14 = smov 0   ;;  %s1402_s15 = smov 0  }
   0x5 LB: > { %s1417_s16 = sadd.s32 4294967295, %s1363_s15   ;;  %s1086_s17 = sadd.s32 4294967294, %s1363_s15   ;;  %s1363_s15 = sphi %s1402_s15, %s1834_s15   ;;  %s1359_s14 = sphi %s1400_s14, %s1833_s14   ;;  %s1355_s13 = sphi %s1398_s13, %s1832_s13   ;;  %s1351_s12 = sphi %s1396_s12, %s1831_s12  }
   0x6   : > { %s1421_s18 = sadd.s32 1, %s1363_s15   ;;  %s26_s19 = sadd.s32 1, %s1359_s14 }
   0x7   : > { %s23_s20 = ssub.s32 %s1363_s15, %s1421_s18  ;;  %p33_p0 = scmp.ne.s32.totalorder %s1359_s14, %s1355_s13 }
   0x8   : > { %p24_p1 = scmp.eq.s32.totalorder %s23_s20, 0  ;;  %p34_p2 = scmp.eq.s32.totalorder %s1363_s15, 0 }
   0x9   : > { %p39_p3 = scmp.ne.s32.totalorder %s1355_s13, %s1351_s12  ;;  %p40_p4 = scmp.eq.s32.totalorder %s1417_s16, 0 }
   0xa   : > { %s1433_s21 = scalar_select %p24_p1, %s1359_s14, %s26_s19  }
   0xb   : > { %p1435_p5 = por %p34_p2, %p33_p0  ;;  %p1439_p6 = por %p40_p4, %p39_p3 }
   0xc   : > { %p105_p7 = scmp.eq.s32.totalorder %s1417_s16, 1  ;;  %p111_p8 = scmp.eq.s32.totalorder %s1086_s17, 1 }
   0xd   : > { %s1823_s23 = scalar_select %p1439_p6, 1, 0 }
   0xe   : > { %p1226_p10 = scmp.lt.s32.totalorder %s1363_s15, 2  ;;  %p1446_p11 = por %p105_p7, %p33_p0 }
   0xf   : > { %p1450_p12 = por %p111_p8, %p39_p3  ;;  %s137_s26 = sand.u32 1, %s1359_s14  }
  0x10   : > { %s1824_s24 = scalar_select %p1446_p11, 1, 0 }
  0x11   : > { %s1825_s25 = scalar_select %p1450_p12, 1, 0 }
  0x12   : > { %s1120_s27 = sshll.u32 %s1363_s15, 11  ;;  %s1089_s28 = sshll.u32 %s137_s26, 7 }
  0x13   : > { %s1459_s4 = scalar_lea.hbm %s1816_s0, %s1120_s27  ;;  %s141_s5 = scalar_lea.vmem [#allocation3], %s1089_s28 }
  0x14   : > { %s148_s6 = sshll.u32 %s141_s5, 4  ;;  %p1463_p13 = pnand %p1226_p10, %p1435_p5  ;;  %s1467_s6 = int_to_ptr.vmem [resolvable:$true] %s148_s6 }
  0x15   : > { %s1469_s8 = scalar_lea.sflag [#allocation4], %s137_s26  ;;  %s1271_s9 = scalar_lea.hbm %s1459_s4, 2048 }
  0x16   : > { %p1272_p0 = scmp.ne.s32.totalorder %s1459_s4, %s1271_s9  ;;  %p1273_p1 = pneg %p1463_p13 }
  0x17   : > { %s1276_s17 = scalar_lea.hbm %s1816_s0, 4096  ;;  %p1277_p4 = scmp.lt.s32.totalorder %s1459_s4, %s1816_s0 }
  0x18   : > { %p1274_p2 = pnand %p1273_p1, %p1272_p0  ;;  %p1278_p5 = scmp.lt.s32.totalorder %s1276_s17, %s1271_s9 }
  0x1a   : > { %p1275_p3 = pneg %p1274_p2  ;;  %p1279_p7 = por %p1278_p5, %p1277_p4 }
  0x1c   : > { %p1280_p8 = pnand %p1279_p7, %p1275_p3 }
  0x1e   : > { %1283 = shalt.err (!%p1280_p8)
}
  0x1f   : > { %s1284_s22 = scalar_lea.vmem %s1467_s6, 2048  ;;  %s1365_s26 = smov [#allocation3]  }
  0x20   : > { %p1285_p10 = scmp.ne.s32.totalorder %s1467_s6, %s1284_s22  ;;  %s1289_s27 = sshll.u32 %s1365_s26, 4  ;;  %s1290_s27 = int_to_ptr.vmem [resolvable:$false] %s1289_s27 }
  0x21   : > { %s1291_s28 = scalar_lea.vmem %s1290_s27, 4096  ;;  %p1292_p2 = scmp.lt.s32.totalorder %s1467_s6, %s1290_s27 }
  0x22   : > { %p1287_p9 = pnand %p1285_p10, %p1273_p1  ;;  %p1293_p12 = scmp.lt.s32.totalorder %s1291_s28, %s1284_s22 }
  0x24   : > { %p1288_p0 = pneg %p1287_p9  ;;  %p1294_p11 = por %p1293_p12, %p1292_p2 }
  0x26   : > { %p1295_p6 = pnand %p1294_p11, %p1288_p0 }
  0x28   : > { %1298 = shalt.err (!%p1295_p6)
}
  0x29   : > { %s1366_s29 = smov 128   ;;  %s1367_s30 = smov 8  }
  0x2a   : > { %1221 = dma.hbm_to_vmem [thread:$0]  (!%p1463_p13), %s1459_s4, 2048, %s1467_s6, %s1469_s8, %s1366_s29, %s1366_s29, %s1367_s30  }
  0x2b   : > { %p1092_p9 = scmp.ge.s32.totalorder %s1363_s15, 1  ;;  %p156_p1 = scmp.lt.s32.totalorder %s1363_s15, 3 }
  0x2d   : > { %p157_p3 = pnand %p1092_p9, %p156_p1 }
  0x2e   : > { %s1493_s5 = sand.u32 (!%p157_p3), 1, %s1355_s13   ;;  %p1827_p6 = scmp.ne.s32.totalorder (!%p157_p3), %s1823_s23, 0 }
  0x2f   : > { %160 = sbr.rel (%p157_p3) target bundleno = 1882 (0x75a), region = 32  ;;  %s1093_s9 = sshll.u32 (!%p157_p3), %s1493_s5, 7 }
  0x30   : > { %s163_s10 = scalar_lea.sflag (!%p157_p3), [#allocation4], %s1493_s5  ;;  %s1497_s11 = scalar_lea.vmem (!%p157_p3), [#allocation3], %s1093_s9 }
  0x34   : > { %1342 = dma.done.wait (%p1827_p6), %s163_s10, 2048  }
  0x35   : > { %1344 = vsyncadd (%p1827_p6), %s163_s10, 4294965248  ;;  %v200_v0 = vlaneseq  ;;  %vm192_vm0 = vcmask 7168   ;;  %vm195_vm1 = vcmask 15368   ;;  %v1368_v1 = vmov 0.0   ;;  %v204_v3 = vld [vmem:[%s1497_s11 + $0x8] sm:$0xff]  ;;  %v203_v4 = vld [vmem:[%s1497_s11] sm:$0xff] }
  0x36   : > { %194 = vst.msk [vmem:[#allocation2 + $0x30] sm:$0xff] %vm192_vm0, %v1368_v1  ;;  %193 = vst.msk [vmem:[#allocation2 + $0x20] sm:$0xff] %vm192_vm0, %v1368_v1  ;;  %vm189_vm2 = vcmask 15360   ;;  %v210_v5 = vmax.f32 %v204_v3, 0.0  ;;  %v206_v6 = vadd.f32 %v204_v3, %v204_v3  ;;  %v209_v7 = vmax.f32 %v203_v4, 0.0  ;;  %s1516_s23 = scalar_lea.vmem [#allocation6], %s1093_s9 }
  0x37   : > { %197 = vst.msk [vmem:[#allocation2 + $0x38] sm:$0xff] %vm195_vm1, %v1368_v1  ;;  %196 = vst.msk [vmem:[#allocation2 + $0x28] sm:$0xff] %vm195_vm1, %v1368_v1  ;;  %v1509_v2 = vand.u32 127, %v200_v0  ;;  %v205_v8 = vadd.f32 %v203_v4, %v203_v4  ;;  %s1369_s4 = smov 1   ;;  %s1370_s6 = smov 2   ;;  %vm232_vm4 = vcmask 1047560  }
  0x38   : > { %199 = vst.msk [vmem:[#allocation2 + $0x58] sm:$0xff] %vm189_vm2, %v1368_v1  ;;  %190 = vst.msk [vmem:[#allocation2] sm:$0xff] %vm189_vm2, %v1368_v1  ;;  %s1371_s7 = smov 127   ;;  %vm221_vm5 = vcmask 1047568   ;;  %vm301_vm6 = vcmask 1039360   ;;  %v251_v22 = vld [vmem:[%s1817_s1] sm:$0xff] }
  0x39   : > { %191 = vst.msk [vmem:[#allocation2 + $0x10] sm:$0xff] %vm189_vm2, %v1368_v1  ;;  %198 = vst.msk [vmem:[#allocation2 + $0x48] sm:$0xff] %vm189_vm2, %v1368_v1  ;;  %vm202_vm3 = vcmp.lt.s32.totalorder %v1509_v2, 100  ;;  %vm314_vm7 = vcmask 392192   ;;  %v1372_v27 = vmov 0   ;;  %v254_v33 = vld [vmem:[%s1818_s2 + $0x8] sm:$0xff] }
  0x3a   : > { %v212_v9 = vsel %vm202_vm3, %v210_v5, 0.0  ;;  %208 = vst [vmem:[%s1516_s23 + $0x8] sm:$0xff] %v206_v6  ;;  %207 = vst [vmem:[%s1516_s23] sm:$0xff] %v205_v8  ;;  %v211_v10 = vsel %vm202_vm3, %v209_v7, 0.0  ;;  %1166 = vmatprep.mubr.msk.f32.mxu0 %vm314_vm7, %v251_v22  ;;  %1269 = vset.pattern.permute.xlu0 %v1372_v27  ;;  %v253_v34 = vld [vmem:[%s1818_s2] sm:$0xff]  ;;  %v252_v47 = vld [vmem:[%s1817_s1 + $0x8] sm:$0xff]  ;;  %s1121_s26 = sshll.u32 %s1417_s16, 11 }
  0x3b   : > { %228 = vrot.lane.b32.xlu0 %v212_v9, %s1369_s4  ;;  %217 = vrot.lane.b32.xlu1 %v212_v9, %s1370_s6  ;;  %v1573_v50 = vld [vmem:[%s1497_s11 + $0x18] sm:$0xff]  ;;  %v1576_v54 = vld [vmem:[%s1497_s11 + $0x10] sm:$0xff]  ;;  %s1013_s27 = sshll.u32 %s1516_s23, 4  ;;  %s1769_s30 = scalar_lea.hbm %s1819_s3, %s1121_s26  ;;  %s1771_s27 = int_to_ptr.vmem [resolvable:$true] %s1013_s27 }
  0x3c   : > { %1270 = vset.pattern.permute.xlu1 %v1372_v27  ;;  %v1097_v7 = vld [vmem:[%s1817_s1 + $0x10] sm:$0xff]  ;;  %s1000_s16 = scalar_lea.sflag [#allocation5], %s1493_s5  ;;  %s1299_s9 = scalar_lea.vmem %s1771_s27, 2048 }
  0x3d   : > { %1181 = vmatprep.mubr.msk.f32.mxu1 %vm314_vm7, %v1097_v7  ;;  %v1105_v7 = vld [vmem:[%s1818_s2 + $0x20] sm:$0xff]  ;;  %p1300_p11 = scmp.ne.s32.totalorder %s1771_s27, %s1299_s9  ;;  %p1828_p12 = scmp.ne.s32.totalorder %s1824_s24, 0 }
  0x3f   : > { %226 = vrot.lane.b32.xlu0 %v211_v10, %s1369_s4  ;;  %215 = vrot.lane.b32.xlu1 %v211_v10, %s1370_s6  ;;  %v1526_v11 = vld [vmem:[#allocation2 + $0x58] sm:$0xff]  ;;  %p1301_p13 = pnand %p1300_p11, %p1828_p12 }
  0x40   : > { %v1531_v12 = vld [vmem:[#allocation2 + $0x48] sm:$0xff] }
  0x41   : > { %p1302_p4 = pneg %p1301_p13 }
  0x43   : > { %297 = vrot.lane.b32.xlu0 %v212_v9, %s1371_s7  ;;  %299 = vrot.lane.b32.xlu1 %v1526_v11, %s1371_s7 }
  0x47   : > { %293 = vrot.lane.b32.xlu0 %v211_v10, %s1371_s7  ;;  %295 = vrot.lane.b32.xlu1 %v1531_v12, %s1371_s7 }
  0xad   : > { %v229_v13 = vpop.permute.xlu0 %228  ;;  %v218_v14 = vpop.permute.xlu1 %217 }
  0xae   : > { %235 = vst.msk [vmem:[#allocation2 + $0x30] sm:$0xff] %vm232_vm4, %v229_v13 }
  0xaf   : > { %236 = vst.msk [vmem:[#allocation2 + $0x38] sm:$0xff] %vm192_vm0, %v229_v13 }
  0xb0   : > { %224 = vst.msk [vmem:[#allocation2 + $0x10] sm:$0xff] %vm221_vm5, %v218_v14 }
  0xb1   : > { %225 = vst.msk [vmem:[#allocation2 + $0x18] sm:$0xff] %vm189_vm2, %v218_v14  ;;  %v227_v15 = vpop.permute.xlu0 %226  ;;  %v216_v16 = vpop.permute.xlu1 %215 }
  0xb2   : > { %233 = vst.msk [vmem:[#allocation2 + $0x20] sm:$0xff] %vm232_vm4, %v227_v15 }
  0xb3   : > { %234 = vst.msk [vmem:[#allocation2 + $0x28] sm:$0xff] %vm192_vm0, %v227_v15 }
  0xb4   : > { %222 = vst.msk [vmem:[#allocation2] sm:$0xff] %vm221_vm5, %v216_v16 }
  0xb5   : > { %223 = vst.msk [vmem:[#allocation2 + $0x8] sm:$0xff] %vm189_vm2, %v216_v16  ;;  %v245_v18 = vld [vmem:[#allocation2 + $0x30] sm:$0xff]  ;;  %v298_v19 = vpop.permute.xlu0 %297  ;;  %v300_v20 = vpop.permute.xlu1 %299 }
  0xb6   : > { %v246_v17 = vld [vmem:[#allocation2 + $0x38] sm:$0xff]  ;;  %289 = vrot.lane.b32.xlu0 %v245_v18, %s1371_s7  ;;  %v307_v21 = vsel %vm301_vm6, %v298_v19, %v300_v20  ;;  %v1099_v20 = vld [vmem:[%s1818_s2 + $0x10] sm:$0xff] }
  0xb7   : > { %291 = vrot.lane.b32.xlu1 %v246_v17, %s1371_s7  ;;  %1154 = vmatprep.subr.mxu0 %v307_v21  ;;  %v241_v30 = vld [vmem:[#allocation2 + $0x10] sm:$0xff] }
  0xb8   : > { %1155 = vmatpush3.msra.mxu0 %v307_v21  ;;  %v242_v29 = vld [vmem:[#allocation2 + $0x18] sm:$0xff] }
  0xb9   : > { %v243_v24 = vld [vmem:[#allocation2 + $0x20] sm:$0xff]  ;;  %v294_v25 = vpop.permute.xlu0 %293  ;;  %v296_v26 = vpop.permute.xlu1 %295  ;;  %v1100_v21 = vld [vmem:[%s1818_s2 + $0x18] sm:$0xff] }
  0xba   : > { %v244_v23 = vld [vmem:[#allocation2 + $0x28] sm:$0xff]  ;;  %285 = vrot.lane.b32.xlu0 %v243_v24, %s1371_s7  ;;  %v306_v28 = vsel %vm301_vm6, %v294_v25, %v296_v26 }
  0xbb   : > { %287 = vrot.lane.b32.xlu1 %v244_v23, %s1371_s7  ;;  %1156 = vmatprep.subr.mxu0 %v306_v28  ;;  %v239_v32 = vld [vmem:[#allocation2] sm:$0xff] }
  0xbc   : > { %1157 = vmatpush3.msra.mxu0 %v306_v28  ;;  %v240_v31 = vld [vmem:[#allocation2 + $0x8] sm:$0xff] }
  0xbe   : > { %281 = vrot.lane.b32.xlu0 %v241_v30, %s1371_s7 }
  0xbf   : > { %283 = vrot.lane.b32.xlu1 %v242_v29, %s1371_s7 }
  0xc2   : > { %277 = vrot.lane.b32.xlu0 %v239_v32, %s1371_s7 }
  0xc3   : > { %279 = vrot.lane.b32.xlu1 %v240_v31, %s1371_s7 }
  0xc6   : > { %262 = vperm.xlu0 %1269, %v254_v33  }
  0xc7   : > { %257 = vperm.xlu1 %1270, %v253_v34   ;;  %v1098_v34 = vld [vmem:[%s1817_s1 + $0x18] sm:$0xff] }
 0x128   : > { %v290_v36 = vpop.permute.xlu0 %289 }
 0x129   : > { %v292_v35 = vpop.permute.xlu1 %291 }
 0x12a   : > { %v305_v37 = vsel %vm301_vm6, %v290_v36, %v292_v35 }
 0x12b   : > { %1158 = vmatprep.subr.mxu0 %v305_v37 }
 0x12c   : > { %1159 = vmatpush3.msra.mxu0 %v305_v37  ;;  %v286_v39 = vpop.permute.xlu0 %285  ;;  %v1633_v37 = vld [vmem:[%s1497_s11 + $0x38] sm:$0xff] }
 0x12d   : > { %v288_v38 = vpop.permute.xlu1 %287 }
 0x12e   : > { %v304_v40 = vsel %vm301_vm6, %v286_v39, %v288_v38 }
 0x12f   : > { %1160 = vmatprep.subr.mxu0 %v304_v40 }
 0x130   : > { %1161 = vmatpush3.msra.mxu0 %v304_v40  ;;  %v282_v42 = vpop.permute.xlu0 %281 }
 0x131   : > { %v284_v41 = vpop.permute.xlu1 %283 }
 0x132   : > { %v303_v43 = vsel %vm301_vm6, %v282_v42, %v284_v41  ;;  %v1636_v41 = vld [vmem:[%s1497_s11 + $0x30] sm:$0xff] }
 0x133   : > { %1162 = vmatprep.subr.mxu0 %v303_v43 }
 0x134   : > { %1163 = vmatpush3.msra.mxu0 %v303_v43  ;;  %v278_v45 = vpop.permute.xlu0 %277 }
 0x135   : > { %v280_v44 = vpop.permute.xlu1 %279 }
 0x136   : > { %v302_v46 = vsel %vm301_vm6, %v278_v45, %v280_v44 }
 0x137   : > { %1164 = vmatprep.subr.mxu0 %v302_v46 }
 0x138   : > { %1165 = vmatpush3.msra.mxu0 %v302_v46 }
 0x139   : > { %1167 = vmatmul.mubr.msk.f32.vlgmr.msra.gmra.mxu0 %vm314_vm7, %v252_v47 }
 0x141   : > { %v263_v48 = vpop.permute.xlu0 %262 }
 0x142   : > { %v258_v51 = vpop.permute.xlu1 %257 }
 0x1f9   : > { %v1168_v49 = vpop.f32.mrf.mxu0 }
 0x1fa   : > { %v393_v52 = vadd.f32 %v1168_v49, %v263_v48 }
 0x1fb   : > { %v387_v53 = vpop.f32.mrf.mxu0 }
 0x1fc   : > { %v399_v55 = vadd.f32 %v1573_v50, %v393_v52  ;;  %v411_v56 = vmax.f32 %v393_v52, 0.0  ;;  %v388_v57 = vadd.f32 %v387_v53, %v258_v51 }
 0x1fe   : > { %401 = vst [vmem:[%s1516_s23 + $0x18] sm:$0xff] %v399_v55  ;;  %v398_v58 = vadd.f32 %v1576_v54, %v388_v57  ;;  %v410_v59 = vmax.f32 %v388_v57, 0.0  ;;  %v413_v60 = vsel %vm202_vm3, %v411_v56, 0.0 }
 0x1ff   : > { %428 = vrot.lane.b32.xlu1 %v413_v60, %s1369_s4 }
 0x200   : > { %400 = vst [vmem:[%s1516_s23 + $0x10] sm:$0xff] %v398_v58  ;;  %v412_v61 = vsel %vm202_vm3, %v410_v59, 0.0  ;;  %v1103_v59 = vld [vmem:[%s1817_s1 + $0x20] sm:$0xff] }
 0x201   : > { %426 = vrot.lane.b32.xlu0 %v412_v61, %s1369_s4  ;;  %1196 = vmatprep.mubr.msk.f32.mxu0 %vm314_vm7, %v1103_v59  ;;  %v1111_v59 = vld [vmem:[%s1818_s2 + $0x30] sm:$0xff] }
 0x203   : > { %418 = vrot.lane.b32.xlu1 %v413_v60, %s1370_s6 }
 0x205   : > { %416 = vrot.lane.b32.xlu0 %v412_v61, %s1370_s6 }
 0x207   : > { %498 = vrot.lane.b32.xlu1 %v413_v60, %s1371_s7 }
 0x209   : > { %500 = vrot.lane.b32.xlu0 %v1526_v11, %s1371_s7 }
 0x20b   : > { %494 = vrot.lane.b32.xlu1 %v412_v61, %s1371_s7 }
 0x20d   : > { %496 = vrot.lane.b32.xlu0 %v1531_v12, %s1371_s7 }
 0x271   : > { %v429_v62 = vpop.permute.xlu1 %428 }
 0x272   : > { %434 = vst.msk [vmem:[#allocation2 + $0x30] sm:$0xff] %vm232_vm4, %v429_v62 }
 0x273   : > { %435 = vst.msk [vmem:[#allocation2 + $0x38] sm:$0xff] %vm192_vm0, %v429_v62  ;;  %v427_v63 = vpop.permute.xlu0 %426 }
 0x274   : > { %432 = vst.msk [vmem:[#allocation2 + $0x20] sm:$0xff] %vm232_vm4, %v427_v63 }
 0x275   : > { %433 = vst.msk [vmem:[#allocation2 + $0x28] sm:$0xff] %vm192_vm0, %v427_v63  ;;  %v419_v0 = vpop.permute.xlu1 %418 }
 0x276   : > { %424 = vst.msk [vmem:[#allocation2 + $0x10] sm:$0xff] %vm221_vm5, %v419_v0 }
 0x277   : > { %425 = vst.msk [vmem:[#allocation2 + $0x18] sm:$0xff] %vm189_vm2, %v419_v0  ;;  %v417_v1 = vpop.permute.xlu0 %416 }
 0x278   : > { %422 = vst.msk [vmem:[#allocation2] sm:$0xff] %vm221_vm5, %v417_v1 }
 0x279   : > { %423 = vst.msk [vmem:[#allocation2 + $0x8] sm:$0xff] %vm189_vm2, %v417_v1  ;;  %v499_v3 = vpop.permute.xlu1 %498  ;;  %v444_v5 = vld [vmem:[#allocation2 + $0x30] sm:$0xff] }
 0x27a   : > { %v445_v4 = vld [vmem:[#allocation2 + $0x38] sm:$0xff]  ;;  %490 = vrot.lane.b32.xlu1 %v444_v5, %s1371_s7 }
 0x27b   : > { %492 = vrot.lane.b32.xlu0 %v445_v4, %s1371_s7  ;;  %v501_v6 = vpop.permute.xlu0 %500  ;;  %v442_v17 = vld [vmem:[#allocation2 + $0x20] sm:$0xff] }
 0x27c   : > { %v507_v8 = vsel %vm301_vm6, %v499_v3, %v501_v6  ;;  %v443_v16 = vld [vmem:[#allocation2 + $0x28] sm:$0xff] }
 0x27d   : > { %1169 = vmatprep.subr.mxu1 %v507_v8  ;;  %v440_v10 = vld [vmem:[#allocation2 + $0x10] sm:$0xff]  ;;  %v495_v13 = vpop.permute.xlu1 %494 }
 0x27e   : > { %v441_v9 = vld [vmem:[#allocation2 + $0x18] sm:$0xff]  ;;  %482 = vrot.lane.b32.xlu1 %v440_v10, %s1371_s7  ;;  %1170 = vmatpush3.msra.mxu1 %v507_v8  ;;  %v1106_v8 = vld [vmem:[%s1818_s2 + $0x28] sm:$0xff] }
 0x27f   : > { %484 = vrot.lane.b32.xlu0 %v441_v9, %s1371_s7  ;;  %v497_v14 = vpop.permute.xlu0 %496  ;;  %v438_v19 = vld [vmem:[#allocation2] sm:$0xff] }
 0x280   : > { %v506_v15 = vsel %vm301_vm6, %v495_v13, %v497_v14  ;;  %v439_v18 = vld [vmem:[#allocation2 + $0x8] sm:$0xff] }
 0x281   : > { %1171 = vmatprep.subr.mxu1 %v506_v15 }
 0x282   : > { %486 = vrot.lane.b32.xlu1 %v442_v17, %s1371_s7  ;;  %1172 = vmatpush3.msra.mxu1 %v506_v15 }
 0x283   : > { %488 = vrot.lane.b32.xlu0 %v443_v16, %s1371_s7 }
 0x286   : > { %478 = vrot.lane.b32.xlu1 %v438_v19, %s1371_s7 }
 0x287   : > { %480 = vrot.lane.b32.xlu0 %v439_v18, %s1371_s7 }
 0x28a   : > { %463 = vperm.xlu1 %1270, %v1100_v21  }
 0x28b   : > { %458 = vperm.xlu0 %1269, %v1099_v20  }
 0x2ec   : > { %v491_v22 = vpop.permute.xlu1 %490 }
 0x2ed   : > { %v493_v23 = vpop.permute.xlu0 %492 }
 0x2ee   : > { %v505_v24 = vsel %vm301_vm6, %v491_v22, %v493_v23  ;;  %v1104_v23 = vld [vmem:[%s1817_s1 + $0x28] sm:$0xff] }
 0x2ef   : > { %1173 = vmatprep.subr.mxu1 %v505_v24 }
 0x2f0   : > { %1174 = vmatpush3.msra.mxu1 %v505_v24  ;;  %v483_v25 = vpop.permute.xlu1 %482 }
 0x2f1   : > { %v485_v26 = vpop.permute.xlu0 %484 }
 0x2f2   : > { %v503_v30 = vsel %vm301_vm6, %v483_v25, %v485_v26  ;;  %v795_v26 = vld [vmem:[%s1497_s11 + $0x58] sm:$0xff] }
 0x2f4   : > { %v487_v27 = vpop.permute.xlu1 %486 }
 0x2f5   : > { %v489_v28 = vpop.permute.xlu0 %488 }
 0x2f6   : > { %v504_v29 = vsel %vm301_vm6, %v487_v27, %v489_v28 }
 0x2f7   : > { %1175 = vmatprep.subr.mxu1 %v504_v29 }
 0x2f8   : > { %1176 = vmatpush3.msra.mxu1 %v504_v29  ;;  %v479_v31 = vpop.permute.xlu1 %478 }
 0x2f9   : > { %1177 = vmatprep.subr.mxu1 %v503_v30  ;;  %v481_v32 = vpop.permute.xlu0 %480 }
 0x2fa   : > { %1178 = vmatpush3.msra.mxu1 %v503_v30  ;;  %v502_v33 = vsel %vm301_vm6, %v479_v31, %v481_v32  ;;  %v794_v30 = vld [vmem:[%s1497_s11 + $0x50] sm:$0xff] }
 0x2fb   : > { %1179 = vmatprep.subr.mxu1 %v502_v33 }
 0x2fc   : > { %1180 = vmatpush3.msra.mxu1 %v502_v33 }
 0x2fd   : > { %1182 = vmatmul.mubr.msk.f32.vlgmr.msra.gmra.mxu1 %vm314_vm7, %v1098_v34 }
 0x305   : > { %v464_v35 = vpop.permute.xlu1 %463 }
 0x306   : > { %v459_v39 = vpop.permute.xlu0 %458 }
 0x3bd   : > { %v1183_v36 = vpop.f32.mrf.mxu1 }
 0x3be   : > { %v592_v38 = vadd.f32 %v1183_v36, %v464_v35 }
 0x3bf   : > { %v586_v40 = vpop.f32.mrf.mxu1 }
 0x3c0   : > { %v598_v42 = vadd.f32 %v1633_v37, %v592_v38  ;;  %v610_v43 = vmax.f32 %v592_v38, 0.0  ;;  %v587_v44 = vadd.f32 %v586_v40, %v459_v39 }
 0x3c2   : > { %600 = vst [vmem:[%s1516_s23 + $0x38] sm:$0xff] %v598_v42  ;;  %v597_v45 = vadd.f32 %v1636_v41, %v587_v44  ;;  %v609_v46 = vmax.f32 %v587_v44, 0.0  ;;  %v612_v47 = vsel %vm202_vm3, %v610_v43, 0.0 }
 0x3c3   : > { %627 = vrot.lane.b32.xlu1 %v612_v47, %s1369_s4 }
 0x3c4   : > { %599 = vst [vmem:[%s1516_s23 + $0x30] sm:$0xff] %v597_v45  ;;  %v611_v48 = vsel %vm202_vm3, %v609_v46, 0.0  ;;  %v1109_v45 = vld [vmem:[%s1817_s1 + $0x30] sm:$0xff] }
 0x3c5   : > { %625 = vrot.lane.b32.xlu0 %v611_v48, %s1369_s4  ;;  %1211 = vmatprep.mubr.msk.f32.mxu1 %vm314_vm7, %v1109_v45 }
 0x3c7   : > { %617 = vrot.lane.b32.xlu1 %v612_v47, %s1370_s6 }
 0x3c9   : > { %615 = vrot.lane.b32.xlu0 %v611_v48, %s1370_s6 }
 0x3cb   : > { %697 = vrot.lane.b32.xlu1 %v612_v47, %s1371_s7 }
 0x3cd   : > { %699 = vrot.lane.b32.xlu0 %v1526_v11, %s1371_s7 }
 0x3cf   : > { %693 = vrot.lane.b32.xlu1 %v611_v48, %s1371_s7 }
 0x3d1   : > { %695 = vrot.lane.b32.xlu0 %v1531_v12, %s1371_s7 }
 0x435   : > { %v628_v49 = vpop.permute.xlu1 %627 }
 0x436   : > { %633 = vst.msk [vmem:[#allocation2 + $0x30] sm:$0xff] %vm232_vm4, %v628_v49 }
 0x437   : > { %634 = vst.msk [vmem:[#allocation2 + $0x38] sm:$0xff] %vm192_vm0, %v628_v49  ;;  %v626_v51 = vpop.permute.xlu0 %625 }
 0x438   : > { %631 = vst.msk [vmem:[#allocation2 + $0x20] sm:$0xff] %vm232_vm4, %v626_v51 }
 0x439   : > { %632 = vst.msk [vmem:[#allocation2 + $0x28] sm:$0xff] %vm192_vm0, %v626_v51  ;;  %v618_v52 = vpop.permute.xlu1 %617 }
 0x43a   : > { %623 = vst.msk [vmem:[#allocation2 + $0x10] sm:$0xff] %vm221_vm5, %v618_v52 }
 0x43b   : > { %624 = vst.msk [vmem:[#allocation2 + $0x18] sm:$0xff] %vm189_vm2, %v618_v52  ;;  %v616_v53 = vpop.permute.xlu0 %615 }
 0x43c   : > { %621 = vst.msk [vmem:[#allocation2] sm:$0xff] %vm221_vm5, %v616_v53 }
 0x43d   : > { %622 = vst.msk [vmem:[#allocation2 + $0x8] sm:$0xff] %vm189_vm2, %v616_v53  ;;  %v698_v55 = vpop.permute.xlu1 %697  ;;  %v643_v57 = vld [vmem:[#allocation2 + $0x30] sm:$0xff] }
 0x43e   : > { %v644_v56 = vld [vmem:[#allocation2 + $0x38] sm:$0xff]  ;;  %689 = vrot.lane.b32.xlu1 %v643_v57, %s1371_s7 }
 0x43f   : > { %691 = vrot.lane.b32.xlu0 %v644_v56, %s1371_s7  ;;  %v700_v58 = vpop.permute.xlu0 %699  ;;  %v641_v4 = vld [vmem:[#allocation2 + $0x20] sm:$0xff] }
 0x440   : > { %v706_v60 = vsel %vm301_vm6, %v698_v55, %v700_v58  ;;  %v642_v3 = vld [vmem:[#allocation2 + $0x28] sm:$0xff]  ;;  %v1112_v58 = vld [vmem:[%s1818_s2 + $0x38] sm:$0xff] }
 0x441   : > { %1184 = vmatprep.subr.mxu0 %v706_v60  ;;  %v639_v62 = vld [vmem:[#allocation2 + $0x10] sm:$0xff]  ;;  %v694_v63 = vpop.permute.xlu1 %693 }
 0x442   : > { %v640_v61 = vld [vmem:[#allocation2 + $0x18] sm:$0xff]  ;;  %1185 = vmatpush3.msra.mxu0 %v706_v60  ;;  %681 = vrot.lane.b32.xlu1 %v639_v62, %s1371_s7 }
 0x443   : > { %683 = vrot.lane.b32.xlu0 %v640_v61, %s1371_s7  ;;  %v696_v0 = vpop.permute.xlu0 %695  ;;  %v637_v6 = vld [vmem:[#allocation2] sm:$0xff] }
 0x444   : > { %v705_v1 = vsel %vm301_vm6, %v694_v63, %v696_v0  ;;  %v638_v5 = vld [vmem:[#allocation2 + $0x8] sm:$0xff] }
 0x445   : > { %1186 = vmatprep.subr.mxu0 %v705_v1 }
 0x446   : > { %1187 = vmatpush3.msra.mxu0 %v705_v1  ;;  %685 = vrot.lane.b32.xlu1 %v641_v4, %s1371_s7 }
 0x447   : > { %687 = vrot.lane.b32.xlu0 %v642_v3, %s1371_s7 }
 0x44a   : > { %677 = vrot.lane.b32.xlu1 %v637_v6, %s1371_s7 }
 0x44b   : > { %679 = vrot.lane.b32.xlu0 %v638_v5, %s1371_s7 }
 0x44e   : > { %662 = vperm.xlu1 %1270, %v1106_v8  }
 0x44f   : > { %657 = vperm.xlu0 %1269, %v1105_v7  }
 0x4b0   : > { %v690_v10 = vpop.permute.xlu1 %689 }
 0x4b1   : > { %v692_v9 = vpop.permute.xlu0 %691 }
 0x4b2   : > { %v704_v13 = vsel %vm301_vm6, %v690_v10, %v692_v9  ;;  %v1110_v9 = vld [vmem:[%s1817_s1 + $0x38] sm:$0xff]  ;;  %v402_v10 = vld [vmem:[%s1497_s11 + $0x20] sm:$0xff] }
 0x4b3   : > { %1188 = vmatprep.subr.mxu0 %v704_v13 }
 0x4b4   : > { %1189 = vmatpush3.msra.mxu0 %v704_v13  ;;  %v682_v15 = vpop.permute.xlu1 %681  ;;  %v403_v13 = vld [vmem:[%s1497_s11 + $0x28] sm:$0xff] }
 0x4b5   : > { %v684_v14 = vpop.permute.xlu0 %683 }
 0x4b6   : > { %v702_v20 = vsel %vm301_vm6, %v682_v15, %v684_v14  ;;  %v406_v14 = vadd.f32 %v402_v10, %v1576_v54  ;;  %v407_v15 = vadd.f32 %v403_v13, %v1573_v50 }
 0x4b8   : > { %v686_v17 = vpop.permute.xlu1 %685  ;;  %408 = vst [vmem:[%s1516_s23 + $0x20] sm:$0xff] %v406_v14  ;;  %409 = vst [vmem:[%s1516_s23 + $0x28] sm:$0xff] %v407_v15 }
 0x4b9   : > { %v688_v16 = vpop.permute.xlu0 %687 }
 0x4ba   : > { %v703_v18 = vsel %vm301_vm6, %v686_v17, %v688_v16  ;;  %v601_v16 = vld [vmem:[%s1497_s11 + $0x40] sm:$0xff]  ;;  %v602_v17 = vld [vmem:[%s1497_s11 + $0x48] sm:$0xff] }
 0x4bb   : > { %1190 = vmatprep.subr.mxu0 %v703_v18 }
 0x4bc   : > { %1191 = vmatpush3.msra.mxu0 %v703_v18  ;;  %v678_v21 = vpop.permute.xlu1 %677  ;;  %v800_v18 = vld [vmem:[%s1497_s11 + $0x60] sm:$0xff] }
 0x4bd   : > { %v680_v19 = vpop.permute.xlu0 %679  ;;  %1192 = vmatprep.subr.mxu0 %v702_v20 }
 0x4be   : > { %1193 = vmatpush3.msra.mxu0 %v702_v20  ;;  %v701_v22 = vsel %vm301_vm6, %v678_v21, %v680_v19  ;;  %v605_v19 = vadd.f32 %v601_v16, %v402_v10  ;;  %v606_v20 = vadd.f32 %v602_v17, %v403_v13  ;;  %v801_v21 = vld [vmem:[%s1497_s11 + $0x68] sm:$0xff] }
 0x4bf   : > { %1194 = vmatprep.subr.mxu0 %v701_v22 }
 0x4c0   : > { %1195 = vmatpush3.msra.mxu0 %v701_v22  ;;  %v804_v22 = vadd.f32 %v800_v18, %v1636_v41  ;;  %607 = vst [vmem:[%s1516_s23 + $0x40] sm:$0xff] %v605_v19  ;;  %608 = vst [vmem:[%s1516_s23 + $0x48] sm:$0xff] %v606_v20 }
 0x4c1   : > { %1197 = vmatmul.mubr.msk.f32.vlgmr.msra.gmra.mxu0 %vm314_vm7, %v1104_v23  ;;  %v805_v23 = vadd.f32 %v801_v21, %v1633_v37 }
 0x4c2   : > { %806 = vst [vmem:[%s1516_s23 + $0x60] sm:$0xff] %v804_v22 }
 0x4c3   : > { %807 = vst [vmem:[%s1516_s23 + $0x68] sm:$0xff] %v805_v23 }
 0x4c9   : > { %v663_v24 = vpop.permute.xlu1 %662 }
 0x4ca   : > { %v658_v28 = vpop.permute.xlu0 %657 }
 0x581   : > { %v1198_v25 = vpop.f32.mrf.mxu0 }
 0x582   : > { %v791_v27 = vadd.f32 %v1198_v25, %v663_v24  ;;  %v994_v24 = vld [vmem:[%s1497_s11 + $0x78] sm:$0xff] }
 0x583   : > { %v785_v29 = vpop.f32.mrf.mxu0 }
 0x584   : > { %v797_v31 = vadd.f32 %v795_v26, %v791_v27  ;;  %v809_v32 = vmax.f32 %v791_v27, 0.0  ;;  %v786_v33 = vadd.f32 %v785_v29, %v658_v28  ;;  %v993_v27 = vld [vmem:[%s1497_s11 + $0x70] sm:$0xff]  ;;  %s1373_s11 = smov [#allocation6]  }
 0x585   : > { %s1303_s10 = sshll.u32 %s1373_s11, 4  ;;  %s1304_s10 = int_to_ptr.vmem [resolvable:$false] %s1303_s10 }
 0x586   : > { %799 = vst [vmem:[%s1516_s23 + $0x58] sm:$0xff] %v797_v31  ;;  %v796_v34 = vadd.f32 %v794_v30, %v786_v33  ;;  %v808_v35 = vmax.f32 %v786_v33, 0.0  ;;  %v811_v36 = vsel %vm202_vm3, %v809_v32, 0.0  ;;  %p1306_p5 = scmp.lt.s32.totalorder %s1771_s27, %s1304_s10 }
 0x587   : > { %826 = vrot.lane.b32.xlu1 %v811_v36, %s1369_s4 }
 0x588   : > { %798 = vst [vmem:[%s1516_s23 + $0x50] sm:$0xff] %v796_v34  ;;  %v810_v38 = vsel %vm202_vm3, %v808_v35, 0.0 }
 0x589   : > { %824 = vrot.lane.b32.xlu0 %v810_v38, %s1369_s4  ;;  %s1305_s4 = scalar_lea.vmem %s1304_s10, 4096 }
 0x58a   : > { %p1307_p7 = scmp.lt.s32.totalorder %s1305_s4, %s1299_s9 }
 0x58b   : > { %816 = vrot.lane.b32.xlu1 %v811_v36, %s1370_s6 }
 0x58c   : > { %p1308_p8 = por %p1307_p7, %p1306_p5 }
 0x58d   : > { %814 = vrot.lane.b32.xlu0 %v810_v38, %s1370_s6 }
 0x58e   : > { %p1309_p10 = pnand %p1308_p8, %p1302_p4 }
 0x58f   : > { %896 = vrot.lane.b32.xlu1 %v811_v36, %s1371_s7 }
 0x591   : > { %898 = vrot.lane.b32.xlu0 %v1526_v11, %s1371_s7 }
 0x593   : > { %892 = vrot.lane.b32.xlu1 %v810_v38, %s1371_s7 }
 0x595   : > { %894 = vrot.lane.b32.xlu0 %v1531_v12, %s1371_s7 }
 0x5f9   : > { %v827_v39 = vpop.permute.xlu1 %826 }
 0x5fa   : > { %832 = vst.msk [vmem:[#allocation2 + $0x30] sm:$0xff] %vm232_vm4, %v827_v39 }
 0x5fb   : > { %833 = vst.msk [vmem:[#allocation2 + $0x38] sm:$0xff] %vm192_vm0, %v827_v39  ;;  %v825_v2 = vpop.permute.xlu0 %824 }
 0x5fc   : > { %830 = vst.msk [vmem:[#allocation2 + $0x20] sm:$0xff] %vm232_vm4, %v825_v2 }
 0x5fd   : > { %831 = vst.msk [vmem:[#allocation2 + $0x28] sm:$0xff] %vm192_vm0, %v825_v2  ;;  %v817_v40 = vpop.permute.xlu1 %816 }
 0x5fe   : > { %822 = vst.msk [vmem:[#allocation2 + $0x10] sm:$0xff] %vm221_vm5, %v817_v40 }
 0x5ff   : > { %823 = vst.msk [vmem:[#allocation2 + $0x18] sm:$0xff] %vm189_vm2, %v817_v40  ;;  %v815_v11 = vpop.permute.xlu0 %814 }
 0x600   : > { %820 = vst.msk [vmem:[#allocation2] sm:$0xff] %vm221_vm5, %v815_v11 }
 0x601   : > { %821 = vst.msk [vmem:[#allocation2 + $0x8] sm:$0xff] %vm189_vm2, %v815_v11  ;;  %v897_v12 = vpop.permute.xlu1 %896  ;;  %v842_v43 = vld [vmem:[#allocation2 + $0x30] sm:$0xff] }
 0x602   : > { %v843_v42 = vld [vmem:[#allocation2 + $0x38] sm:$0xff]  ;;  %888 = vrot.lane.b32.xlu1 %v842_v43, %s1371_s7 }
 0x603   : > { %890 = vrot.lane.b32.xlu0 %v843_v42, %s1371_s7  ;;  %v899_v44 = vpop.permute.xlu0 %898  ;;  %v840_v55 = vld [vmem:[#allocation2 + $0x20] sm:$0xff] }
 0x604   : > { %v905_v46 = vsel %vm301_vm6, %v897_v12, %v899_v44  ;;  %v841_v53 = vld [vmem:[#allocation2 + $0x28] sm:$0xff] }
 0x605   : > { %1199 = vmatprep.subr.mxu1 %v905_v46  ;;  %v838_v48 = vld [vmem:[#allocation2 + $0x10] sm:$0xff]  ;;  %v893_v49 = vpop.permute.xlu1 %892 }
 0x606   : > { %v839_v47 = vld [vmem:[#allocation2 + $0x18] sm:$0xff]  ;;  %880 = vrot.lane.b32.xlu1 %v838_v48, %s1371_s7  ;;  %1200 = vmatpush3.msra.mxu1 %v905_v46 }
 0x607   : > { %882 = vrot.lane.b32.xlu0 %v839_v47, %s1371_s7  ;;  %v895_v51 = vpop.permute.xlu0 %894  ;;  %v836_v57 = vld [vmem:[#allocation2] sm:$0xff] }
 0x608   : > { %v904_v52 = vsel %vm301_vm6, %v893_v49, %v895_v51  ;;  %v837_v56 = vld [vmem:[#allocation2 + $0x8] sm:$0xff] }
 0x609   : > { %1201 = vmatprep.subr.mxu1 %v904_v52 }
 0x60a   : > { %884 = vrot.lane.b32.xlu1 %v840_v55, %s1371_s7  ;;  %1202 = vmatpush3.msra.mxu1 %v904_v52 }
 0x60b   : > { %886 = vrot.lane.b32.xlu0 %v841_v53, %s1371_s7 }
 0x60e   : > { %876 = vrot.lane.b32.xlu1 %v836_v57, %s1371_s7 }
 0x60f   : > { %878 = vrot.lane.b32.xlu0 %v837_v56, %s1371_s7 }
 0x612   : > { %856 = vperm.xlu1 %1270, %v1111_v59  }
 0x613   : > { %861 = vperm.xlu0 %1269, %v1112_v58  }
 0x674   : > { %v889_v61 = vpop.permute.xlu1 %888 }
 0x675   : > { %v891_v60 = vpop.permute.xlu0 %890 }
 0x676   : > { %v903_v62 = vsel %vm301_vm6, %v889_v61, %v891_v60 }
 0x677   : > { %1203 = vmatprep.subr.mxu1 %v903_v62 }
 0x678   : > { %1204 = vmatpush3.msra.mxu1 %v903_v62  ;;  %v881_v0 = vpop.permute.xlu1 %880 }
 0x679   : > { %v883_v63 = vpop.permute.xlu0 %882 }
 0x67a   : > { %v901_v5 = vsel %vm301_vm6, %v881_v0, %v883_v63 }
 0x67c   : > { %v885_v3 = vpop.permute.xlu1 %884 }
 0x67d   : > { %v887_v1 = vpop.permute.xlu0 %886 }
 0x67e   : > { %v902_v4 = vsel %vm301_vm6, %v885_v3, %v887_v1 }
 0x67f   : > { %1205 = vmatprep.subr.mxu1 %v902_v4 }
 0x680   : > { %1206 = vmatpush3.msra.mxu1 %v902_v4  ;;  %v877_v7 = vpop.permute.xlu1 %876 }
 0x681   : > { %v879_v6 = vpop.permute.xlu0 %878  ;;  %1207 = vmatprep.subr.mxu1 %v901_v5 }
 0x682   : > { %1208 = vmatpush3.msra.mxu1 %v901_v5  ;;  %v900_v8 = vsel %vm301_vm6, %v877_v7, %v879_v6 }
 0x683   : > { %1209 = vmatprep.subr.mxu1 %v900_v8 }
 0x684   : > { %1210 = vmatpush3.msra.mxu1 %v900_v8 }
 0x685   : > { %1212 = vmatmul.mubr.msk.f32.vlgmr.msra.gmra.mxu1 %vm314_vm7, %v1110_v9 }
 0x68d   : > { %v857_v41 = vpop.permute.xlu1 %856 }
 0x68e   : > { %v862_v50 = vpop.permute.xlu0 %861 }
 0x745   : > { %v1213_v54 = vpop.f32.mrf.mxu1 }
 0x746   : > { %v990_v25 = vadd.f32 %v1213_v54, %v862_v50 }
 0x747   : > { %v984_v26 = vpop.f32.mrf.mxu1 }
 0x748   : > { %v996_v28 = vadd.f32 %v994_v24, %v990_v25  ;;  %v985_v29 = vadd.f32 %v984_v26, %v857_v41 }
 0x74a   : > { %998 = vst [vmem:[%s1516_s23 + $0x78] sm:$0xff] %v996_v28  ;;  %v995_v37 = vadd.f32 %v993_v27, %v985_v29 }
 0x74c   : > { %997 = vst [vmem:[%s1516_s23 + $0x70] sm:$0xff] %v995_v37 }
 0x74d   : > { %1312 = shalt.err (!%p1309_p10)
}
 0x74e   : > { %s1313_s23 = scalar_lea.hbm %s1769_s30, 2048  ;;  %s1317_s17 = scalar_lea.hbm %s1819_s3, 4096 }
 0x74f   : > { %p1314_p0 = scmp.ne.s32.totalorder %s1769_s30, %s1313_s23  ;;  %p1318_p1 = scmp.lt.s32.totalorder %s1769_s30, %s1819_s3 }
 0x750   : > { %p1319_p3 = scmp.lt.s32.totalorder %s1317_s17, %s1313_s23 }
 0x751   : > { %p1315_p2 = pnand %p1314_p0, %p1828_p12 }
 0x752   : > { %p1320_p6 = por %p1319_p3, %p1318_p1 }
 0x753   : > { %p1316_p9 = pneg %p1315_p2 }
 0x755   : > { %p1321_p11 = pnand %p1320_p6, %p1316_p9 }
 0x757   : > { %1324 = shalt.err (!%p1321_p11)
}
 0x758   : > { %s1374_s7 = smov 128   ;;  %s1375_s22 = smov 8  }
 0x759   : > { %1216 = dma.vmem_to_hbm [thread:$0]  (%p1828_p12), %s1771_s27, 2048, %s1769_s30, %s1000_s16, %s1374_s7, %s1374_s7, %s1375_s22  }
 0x75a PF: > { %s1028_s26 = sand.u32 1, %s1351_s12   ;;  %p1829_p13 = scmp.ne.s32.totalorder %s1825_s25, 0 }
 0x75b   : > { %p1830_p4 = scmp.ge.s32.totalorder %s1363_s15, 2  ;;  %s1029_s28 = scalar_lea.sflag [#allocation5], %s1028_s26 }
 0x75d   : > { %p1223_p5 = pnand %p1830_p4, %p1829_p13 }
 0x75f   : > { %p1224_p7 = pneg %p1223_p5 }
 0x761   : > { %1346 = dma.done.wait (%p1224_p7), %s1029_s28, 2048  }
 0x762   : > { %1348 = vsyncadd (%p1224_p7), %s1029_s28, 4294965248  ;;  %p16_p8 = scmp.ge.s32.totalorder %s1421_s18, 4   ;;  %s1831_s12 = smov %s1355_s13 }
 0x763   : > { %s1832_s13 = smov %s1359_s14  ;;  %s1833_s14 = smov %s1433_s21 }
 0x764   : > { %s1834_s15 = smov %s1421_s18  ;;  %18 = sbr.rel (!%p16_p8) target bundleno = 5 (0x5), region = 83 }
 0x769   :  { %1034 = vsyncpa [#allocation4], 1 }
 0x76a   :  { %1036 = vsyncpa [#allocation4 + $0x1], 1 }
 0x76b   :  { %1037 = vsyncpa [#allocation5], 1 }
 0x76c   :  { %1039 = vsyncpa [#allocation5 + $0x1], 1 }

</bundles_post_ra>
